<compile_context>
chip_gen: v6e
topology: v6e:2x2x1
jax: 0.10.0
libtpu: 0.0.40
codegen_flags: <defaults>
</compile_context>

<pallas_src>
import functools

import jax
import jax.numpy as jnp
from jax.experimental import pallas as pl
from jax.experimental.pallas import tpu as pltpu


_VMEM_BUDGET_BYTES = 32 * 1024 * 1024   # conservative across v5e / v6e / v7x
_TARGET_FUSED_ROWS = 2048               # fused (TB * S_pad) MXU rows per grid step


def gated_attention_kernel(v_ref, w_fused_ref, b_fused_ref, w_row_ref,
                           scaled_ref, weights_ref, *, seq_len, bf16_activations):
    tb, s_pad, d = v_ref.shape                            # (TB, S_pad, D_pad), bf16

    v = v_ref[...]                                        # bf16
    v2d = v.reshape(tb * s_pad, d)                        # free: S_pad%8==0, D_pad%128==0

    # Single fused (D, 2D) GEMM on the MXU, f32 accumulation.
    pre = jnp.dot(v2d, w_fused_ref[...], preferred_element_type=jnp.float32)
    pre = pre + b_fused_ref[...]                          # (TB*S_pad, 2*D_pad) f32

    if bf16_activations:
        # Small-D regime on v6e/v7x: EUP is the binding unit, bf16 transcendentals ~2x.
        pre = pre.astype(jnp.bfloat16)
    h = jnp.tanh(pre[:, :d])                              # lane-aligned slice
    u = jax.nn.sigmoid(pre[:, d:])
    hu = (h * u).astype(jnp.float32)                      # logits path stays f32

    # Attention logits: VPU multiply + cross-lane (XLU) reduce instead of an N=1 MXU
    # matmul. w_row is pre-scaled by 1/temperature in the wrapper; b_w is a constant
    # logit shift (softmax-invariant) and was dropped entirely.
    w_row = w_row_ref[...]                                # (1, D_pad) f32
    logits = jnp.sum(hu.reshape(tb, s_pad, d) * w_row, axis=-1)      # (TB, S_pad)

    if s_pad > seq_len:                                   # mask padded sequence positions
        pos = jax.lax.broadcasted_iota(jnp.int32, (tb, s_pad), 1)
        logits = jnp.where(pos < seq_len, logits, jnp.float32(-1e30))

    # Softmax over the sequence (lane) axis.
    m = jnp.max(logits, axis=-1, keepdims=True)           # (TB, 1)
    p = jnp.exp(logits - m)                               # (TB, S_pad)
    weights = p / jnp.sum(p, axis=-1, keepdims=True)      # (TB, S_pad) f32

    # Pooled output: VPU broadcast-multiply + sublane reduce (avoids M=1 MXU pushes).
    vf32 = v.astype(jnp.float32)
    scaled = jnp.sum(weights[:, :, None] * vf32, axis=1)  # (TB, D_pad) f32

    scaled_ref[...] = scaled.astype(scaled_ref.dtype)     # lane-dense stores
    weights_ref[...] = weights.astype(weights_ref.dtype)


def _round_up(x, m):
    return ((x + m - 1) // m) * m


def _pad_to(x, axis, size):
    pad = size - x.shape[axis]
    if pad == 0:
        return x
    widths = [(0, 0)] * x.ndim
    widths[axis] = (0, pad)
    return jnp.pad(x, widths)


def _per_step_bytes(s_pad, d_pad):
    """Approximate VMEM bytes for the weights (resident) and per batch element."""
    resident = 2 * d_pad * (2 * d_pad)            # fused bf16 weights, single-buffered
    resident += 4 * (2 * d_pad) + 4 * d_pad       # f32 biases + w_row
    per_tb = (2 * 2 * s_pad * d_pad               # double-buffered bf16 v tile
              + 2 * 4 * (d_pad + s_pad)           # double-buffered f32 outputs
              + 24 * s_pad * d_pad)               # f32 in-kernel intermediates
    return resident, per_tb


def _choose_batch_tile(batch, s_pad, d_pad):
    resident, per_tb = _per_step_bytes(s_pad, d_pad)
    fit = max(1, (_VMEM_BUDGET_BYTES - resident) // per_tb)
    rows = max(1, _TARGET_FUSED_ROWS // s_pad)
    tb = int(min(batch, fit, rows))
    if tb >= batch:
        tb = batch                                # block == full dim: always layout-legal
        half = batch // 2
        # Ensure >=2 grid steps (both v7x TensorCores) when alignment allows it.
        if batch % 2 == 0 and half % 8 == 0:
            tb = half
    else:
        tb = (tb // 8) * 8                        # keep 2-D output blocks sublane-aligned
        if tb == 0:
            # Per-element footprint exceeds the budget: smallest legal tile.
            # TODO(synk): add a K/S-tiled accumulator path (grid axis marked
            # "arbitrary") for very large S*D per element / large D on v7x (64 MiB VMEM).
            tb = batch if batch < 8 else 8
    return tb


def _use_bf16_activations(d_pad):
    if d_pad > 256:
        return False
    try:
        kind = jax.devices()[0].device_kind.lower()
    except Exception:
        return False
    # bf16 EUP/VPU only on v6e / v7x; older generations (incl. v5e) stay f32.
    return ("v6" in kind) or ("v7" in kind) or ("7x" in kind)


def gated_attention(v, params, temperature: float = 1.0):
    """v: (B, S, D) -> (scaled_attention (B, D), attention_weights (B, S, 1))."""
    B, S, D = v.shape
    out_dtype = v.dtype
    D_pad = _round_up(D, 128)                 # full-lane feature dim
    S_pad = _round_up(S, 8)                   # sublane-aligned sequence dim
    tb = _choose_batch_tile(B, S_pad, D_pad)
    B_pad = _round_up(B, tb)

    inv_temperature = 1.0 / float(temperature)

    # Zero-padding is mathematically inert: padded D cols give tanh(0)*sigmoid(0)=0
    # with zero w_row entries, padded S rows are masked before the softmax, padded
    # batch rows are sliced off.
    v_p = _pad_to(_pad_to(_pad_to(v, 2, D_pad), 1, S_pad), 0, B_pad).astype(jnp.bfloat16)

    w_att = _pad_to(_pad_to(params["w_att"], 0, D_pad), 1, D_pad)
    w_gate = _pad_to(_pad_to(params["w_gate"], 0, D_pad), 1, D_pad)
    w_fused = jnp.concatenate([w_att, w_gate], axis=1).astype(jnp.bfloat16)   # (D, 2D)
    b_fused = jnp.concatenate(
        [_pad_to(params["b_att"], 1, D_pad), _pad_to(params["b_gate"], 1, D_pad)],
        axis=1).astype(jnp.float32)                                            # (1, 2D)
    # Fold 1/temperature into the logits weight row; drop b_w (softmax-invariant).
    w_row = (_pad_to(params["w_w"].reshape(1, D), 1, D_pad)
             * jnp.float32(inv_temperature)).astype(jnp.float32)               # (1, D)

    resident, per_tb = _per_step_bytes(S_pad, D_pad)
    vmem_need = resident + tb * per_tb
    vmem_limit = int(min(max(int(vmem_need * 1.5), 32 * 1024 * 1024),
                         64 * 1024 * 1024))

    kernel = functools.partial(gated_attention_kernel,
                               seq_len=S,
                               bf16_activations=_use_bf16_activations(D_pad))

    scaled, weights = pl.pallas_call(
        kernel,
        out_shape=(
            jax.ShapeDtypeStruct((B_pad, D_pad), out_dtype),   # pooled features
            jax.ShapeDtypeStruct((B_pad, S_pad), out_dtype),   # lane-dense weights slab
        ),
        grid=(B_pad // tb,),
        in_specs=[
            pl.BlockSpec((tb, S_pad, D_pad), lambda i: (i, 0, 0)),        # v tile (bf16)
            pl.BlockSpec((D_pad, 2 * D_pad), lambda i: (0, 0),
                         pipeline_mode=pl.Buffered(1)),                   # fused W (bf16)
            pl.BlockSpec((1, 2 * D_pad), lambda i: (0, 0),
                         pipeline_mode=pl.Buffered(1)),                   # fused bias
            pl.BlockSpec((1, D_pad), lambda i: (0, 0),
                         pipeline_mode=pl.Buffered(1)),                   # logits row
        ],
        out_specs=(
            pl.BlockSpec((tb, D_pad), lambda i: (i, 0)),
            pl.BlockSpec((tb, S_pad), lambda i: (i, 0)),
        ),
        compiler_params=pltpu.CompilerParams(
            dimension_semantics=("parallel",),
            vmem_limit_bytes=vmem_limit),
    )(v_p, w_fused, b_fused, w_row)

    scaled = scaled[:B, :D]                        # (B, D)
    weights = weights[:B, :S].reshape(B, S, 1)     # (B, S, 1)
    return scaled, weights


def init_params(key, d_model):
    # Deterministic init mimicking torch.nn.Linear (uniform(-1/sqrt(in), 1/sqrt(in))).
    bound = 1.0 / jnp.sqrt(jnp.float32(d_model))
    ks = jax.random.split(key, 6)
    # Weights stored pre-transposed as (D_in, D_out) so the kernel does x @ W.
    return {
        "w_att": jax.random.uniform(ks[0], (d_model, d_model), jnp.float32, -bound, bound),
        "b_att": jax.random.uniform(ks[1], (1, d_model), jnp.float32, -bound, bound),
        "w_gate": jax.random.uniform(ks[2], (d_model, d_model), jnp.float32, -bound, bound),
        "b_gate": jax.random.uniform(ks[3], (1, d_model), jnp.float32, -bound, bound),
        "w_w": jax.random.uniform(ks[4], (d_model, 1), jnp.float32, -bound, bound),
        "b_w": jax.random.uniform(ks[5], (1, 1), jnp.float32, -bound, bound),
    }


def gated_attention_ref(v, params, temperature: float = 1.0):
    # Pure-JAX f32 reference for correctness checking (keeps b_w; softmax-invariant).
    h = jnp.tanh(v @ params["w_att"] + params["b_att"][0])
    u = jax.nn.sigmoid(v @ params["w_gate"] + params["b_gate"][0])
    logits = ((h * u) @ params["w_w"] + params["b_w"][0]) / temperature   # (B, S, 1)
    weights = jax.nn.softmax(logits, axis=1)
    scaled = jnp.einsum("bsi,bsd->bd", weights, v)
    return scaled, weights


if __name__ == "__main__":
    B, S, D = 2, 8, 32
    temperature = 1.0

    key = jax.random.PRNGKey(0)
    k_v, k_p = jax.random.split(key)
    v = jax.random.normal(k_v, (B, S, D), dtype=jnp.float32)
    params = init_params(k_p, D)

    scaled, weights = gated_attention(v, params, temperature)
    jax.block_until_ready((scaled, weights))

    scaled_ref, weights_ref = gated_attention_ref(v, params, temperature)
    assert scaled.shape == (B, D) and weights.shape == (B, S, 1)
    # bf16 v streaming + bf16 MXU inputs (+ bf16 activations on v6e/v7x) vs the
    # pure-f32 reference -> relaxed tolerance.
    assert jnp.allclose(weights, weights_ref, atol=3e-2, rtol=3e-2)
    assert jnp.allclose(scaled, scaled_ref, atol=3e-2, rtol=3e-2)

    print("KERNEL_OK")
</pallas_src>

<mosaic_0001>
module attributes {stable_mosaic.version = 11 : i64} {
  func.func @gated_attention_kernel(%arg0: i32, %arg1: memref<2x8x128xbf16, #tpu.memory_space<vmem>>, %arg2: memref<128x256xbf16, #tpu.memory_space<vmem>>, %arg3: memref<1x256xf32, #tpu.memory_space<vmem>>, %arg4: memref<1x128xf32, #tpu.memory_space<vmem>>, %arg5: memref<2x128xf32, #tpu.memory_space<vmem>>, %arg6: memref<2x8xf32, #tpu.memory_space<vmem>>) attributes {dimension_semantics = [#tpu.dimension_semantics<parallel>], iteration_bounds = array<i64: 1>, scalar_prefetch = 0 : i64, scratch_operands = 0 : i64, tpu.core_type = #tpu.core_type<tc>, window_params = [{transform_indices = @transform_0, window_bounds = array<i64: 2, 8, 128>}, {pipeline_mode = #tpu.pipeline_mode<synchronous>, transform_indices = @transform_1, window_bounds = array<i64: 128, 256>}, {pipeline_mode = #tpu.pipeline_mode<synchronous>, transform_indices = @transform_2, window_bounds = array<i64: 1, 256>}, {pipeline_mode = #tpu.pipeline_mode<synchronous>, transform_indices = @transform_3, window_bounds = array<i64: 1, 128>}, {transform_indices = @transform_4, window_bounds = array<i64: 2, 128>}, {transform_indices = @transform_5, window_bounds = array<i64: 2, 8>}]} {
    %c0 = arith.constant 0 : index
    %c0_0 = arith.constant 0 : index
    %c0_1 = arith.constant 0 : index
    %0 = vector.load %arg1[%c0, %c0_0, %c0_1] : memref<2x8x128xbf16, #tpu.memory_space<vmem>>, vector<2x8x128xbf16>
    %1 = vector.shape_cast %0 : vector<2x8x128xbf16> to vector<16x128xbf16>
    %c0_2 = arith.constant 0 : index
    %c0_3 = arith.constant 0 : index
    %2 = vector.load %arg2[%c0_2, %c0_3] : memref<128x256xbf16, #tpu.memory_space<vmem>>, vector<128x256xbf16>
    %cst = arith.constant dense<0.000000e+00> : vector<16x256xf32>
    %3 = tpu.matmul %1, %2, %cst {dimension_numbers = #tpu.dot_dimension_numbers<[1], [0], [0], [1], [0, 0, 1, 1], [], []>} : vector<16x128xbf16>, vector<128x256xbf16>, vector<16x256xf32> -> vector<16x256xf32>
    %c0_4 = arith.constant 0 : index
    %c0_5 = arith.constant 0 : index
    %4 = vector.load %arg3[%c0_4, %c0_5] : memref<1x256xf32, #tpu.memory_space<vmem>>, vector<1x256xf32>
    %5 = vector.broadcast %4 : vector<1x256xf32> to vector<16x256xf32>
    %6 = arith.addf %3, %5 : vector<16x256xf32>
    %7 = vector.extract_strided_slice %6 {offsets = [0, 0], sizes = [16, 128], strides = [1, 1]} : vector<16x256xf32> to vector<16x128xf32>
    %8 = math.tanh %7 : vector<16x128xf32>
    %9 = vector.extract_strided_slice %6 {offsets = [0, 128], sizes = [16, 128], strides = [1, 1]} : vector<16x256xf32> to vector<16x128xf32>
    %10 = arith.negf %9 : vector<16x128xf32>
    %11 = math.exp %10 : vector<16x128xf32>
    %cst_6 = arith.constant 1.000000e+00 : f32
    %12 = vector.broadcast %cst_6 : f32 to vector<16x128xf32>
    %13 = arith.addf %12, %11 : vector<16x128xf32>
    %14 = arith.divf %12, %13 : vector<16x128xf32>
    %15 = arith.mulf %8, %14 : vector<16x128xf32>
    %c0_7 = arith.constant 0 : index
    %c0_8 = arith.constant 0 : index
    %16 = vector.load %arg4[%c0_7, %c0_8] : memref<1x128xf32, #tpu.memory_space<vmem>>, vector<1x128xf32>
    %17 = vector.shape_cast %15 : vector<16x128xf32> to vector<2x8x128xf32>
    %18 = vector.shape_cast %16 : vector<1x128xf32> to vector<1x1x128xf32>
    %19 = vector.broadcast %18 : vector<1x1x128xf32> to vector<2x8x128xf32>
    %20 = arith.mulf %17, %19 : vector<2x8x128xf32>
    %cst_9 = arith.constant dense<0.000000e+00> : vector<2x8xf32>
    %21 = vector.multi_reduction <add>, %20, %cst_9 [2] : vector<2x8x128xf32> to vector<2x8xf32>
    %cst_10 = arith.constant dense<0xFF800000> : vector<2xf32>
    %22 = vector.multi_reduction <maximumf>, %21, %cst_10 [1] : vector<2x8xf32> to vector<2xf32>
    %23 = vector.shape_cast %22 : vector<2xf32> to vector<2x1xf32>
    %24 = vector.broadcast %23 : vector<2x1xf32> to vector<2x8xf32>
    %25 = arith.subf %21, %24 : vector<2x8xf32>
    %26 = math.exp %25 : vector<2x8xf32>
    %cst_11 = arith.constant dense<0.000000e+00> : vector<2xf32>
    %27 = vector.multi_reduction <add>, %26, %cst_11 [1] : vector<2x8xf32> to vector<2xf32>
    %28 = vector.shape_cast %27 : vector<2xf32> to vector<2x1xf32>
    %29 = vector.broadcast %28 : vector<2x1xf32> to vector<2x8xf32>
    %30 = arith.divf %26, %29 : vector<2x8xf32>
    %31 = arith.extf %0 : vector<2x8x128xbf16> to vector<2x8x128xf32>
    %32 = vector.shape_cast %30 : vector<2x8xf32> to vector<2x8x1xf32>
    %33 = vector.broadcast %32 : vector<2x8x1xf32> to vector<2x8x128xf32>
    %34 = arith.mulf %33, %31 : vector<2x8x128xf32>
    %cst_12 = arith.constant dense<0.000000e+00> : vector<2x128xf32>
    %35 = vector.multi_reduction <add>, %34, %cst_12 [1] : vector<2x8x128xf32> to vector<2x128xf32>
    %c0_13 = arith.constant 0 : index
    %c0_14 = arith.constant 0 : index
    %36 = vector.load %arg5[%c0_13, %c0_14] : memref<2x128xf32, #tpu.memory_space<vmem>>, vector<2x128xf32>
    tpu.vector_store %arg5[%c0_13, %c0_14], %35 {strides = array<i32>} : memref<2x128xf32, #tpu.memory_space<vmem>>, vector<2x128xf32>,
    %c0_15 = arith.constant 0 : index
    %c0_16 = arith.constant 0 : index
    %37 = vector.load %arg6[%c0_15, %c0_16] : memref<2x8xf32, #tpu.memory_space<vmem>>, vector<2x8xf32>
    tpu.vector_store %arg6[%c0_15, %c0_16], %30 {strides = array<i32>} : memref<2x8xf32, #tpu.memory_space<vmem>>, vector<2x8xf32>,
    return
  }
  func.func @transform_0(%arg0: i32) -> (i32, i32, i32) {
    %c0_i32 = arith.constant 0 : i32
    %c0_i32_0 = arith.constant 0 : i32
    %c0_i32_1 = arith.constant 0 : i32
    return %arg0, %c0_i32, %c0_i32_0 : i32, i32, i32
  }
  func.func @transform_1(%arg0: i32) -> (i32, i32) {
    %c0_i32 = arith.constant 0 : i32
    %c0_i32_0 = arith.constant 0 : i32
    %c0_i32_1 = arith.constant 0 : i32
    return %c0_i32, %c0_i32_0 : i32, i32
  }
  func.func @transform_2(%arg0: i32) -> (i32, i32) {
    %c0_i32 = arith.constant 0 : i32
    %c0_i32_0 = arith.constant 0 : i32
    %c0_i32_1 = arith.constant 0 : i32
    return %c0_i32, %c0_i32_0 : i32, i32
  }
  func.func @transform_3(%arg0: i32) -> (i32, i32) {
    %c0_i32 = arith.constant 0 : i32
    %c0_i32_0 = arith.constant 0 : i32
    %c0_i32_1 = arith.constant 0 : i32
    return %c0_i32, %c0_i32_0 : i32, i32
  }
  func.func @transform_4(%arg0: i32) -> (i32, i32) {
    %c0_i32 = arith.constant 0 : i32
    %c0_i32_0 = arith.constant 0 : i32
    return %arg0, %c0_i32 : i32, i32
  }
  func.func @transform_5(%arg0: i32) -> (i32, i32) {
    %c0_i32 = arith.constant 0 : i32
    %c0_i32_0 = arith.constant 0 : i32
    return %arg0, %c0_i32 : i32, i32
  }
}

</mosaic_0001>

<bundles_post_ra>
// kernel: tpu_custom_call.1
= control target key start
LH: loop header
LB: loop body
LE: loop exit
PB: predicated region body
PF: predicated region fallthrough
CT: control target
= control target key end

     0   :  { %11 = vsyncpa [#allocation3], 0  ;;  %s621_s0 = inlined_call_operand.hbm [shape: bf16[2,8,128], index: 0, kind: input, shape index: {}]   ;;  %s622_s1 = inlined_call_operand.hbm [shape: bf16[128,256], index: 1, kind: input, shape index: {}]   ;;  %s623_s2 = inlined_call_operand.vmem [shape: f32[1,256], index: 2, kind: input, shape index: {}]   ;;  %s624_s3 = inlined_call_operand.vmem [shape: f32[1,128], index: 3, kind: input, shape index: {}]   ;;  %s625_s4 = inlined_call_operand.hbm [shape: f32[2,128], index: 4, kind: output, shape index: {0}]   ;;  %s626_s5 = inlined_call_operand.hbm [shape: f32[2,8], index: 5, kind: output, shape index: {1}]  }
   0x1   :  { %12 = vsyncpa [#allocation6], 0 }
   0x2   :  { %13 = vsyncpa [#allocation4], 0 }
   0x3   :  { %14 = vsyncpa [#allocation9], 0  ;;  %s547_s18 = smov [#allocation2]  }
   0x4   :  { %s20_s19 = sshll.u32 %s547_s18, 4  ;;  %s21_s19 = int_to_ptr.vmem [resolvable:$true] %s20_s19 }
   0x5   :  { %s467_s20 = scalar_lea.vmem %s21_s19, 128  ;;  %p472_p1 = scmp.lt.s32.totalorder %s21_s19, %s21_s19 }
   0x6   :  { %p468_p0 = scmp.ne.s32.totalorder %s21_s19, %s467_s20  ;;  %p473_p2 = scmp.lt.s32.totalorder %s467_s20, %s467_s20 }
   0x8   :  { %p474_p3 = por %p473_p2, %p472_p1 }
   0xa   :  { %p475_p4 = pnand %p474_p3, %p468_p0 }
   0xc   :  { %478 = shalt.err (!%p475_p4)
}
   0xd   :  { %s548_s21 = smov 64   ;;  %s549_s22 = smov 4  }
   0xe   :  { %26 = dma.hbm_to_vmem [thread:$0]  %s621_s0, 128, %s21_s19, [#allocation3], %s548_s21, %s548_s21, %s549_s22  }
   0xf   :  { %s550_s25 = smov [#allocation5]  }
  0x10   :  { %s32_s26 = sshll.u32 %s550_s25, 4  ;;  %s33_s26 = int_to_ptr.vmem [resolvable:$true] %s32_s26 }
  0x11   :  { %s487_s27 = scalar_lea.vmem %s33_s26, 2048  ;;  %p492_p6 = scmp.lt.s32.totalorder %s33_s26, %s33_s26 }
  0x12   :  { %p488_p5 = scmp.ne.s32.totalorder %s33_s26, %s487_s27  ;;  %p493_p7 = scmp.lt.s32.totalorder %s487_s27, %s487_s27 }
  0x14   :  { %p494_p8 = por %p493_p7, %p492_p6 }
  0x16   :  { %p495_p9 = pnand %p494_p8, %p488_p5 }
  0x18   :  { %498 = shalt.err (!%p495_p9)
}
  0x19   :  { %s551_s28 = smov 128   ;;  %s552_s29 = smov 8  }
  0x1a   :  { %38 = dma.hbm_to_vmem [thread:$0]  %s622_s1, 2048, %s33_s26, [#allocation6], %s551_s28, %s551_s28, %s552_s29  }
  0x1b   :  { %539 = dma.done.wait [#allocation3], 128  }
  0x1c   :  { %540 = vsyncadd [#allocation3], 4294967168 }
  0x1d   :  { %541 = dma.done.wait [#allocation6], 2048  }
  0x1e   :  { %542 = vsyncadd [#allocation6], 4294965248  ;;  %v553_v0 = vmov 0   ;;  %v413_v1 = vld [vmem:[#allocation5 + $0x74] ss:$8 sps:$4 sm:$0xff]   ;;  %v70_v18 = vlaneseq  ;;  %vm250_vm0 = vcmask 1041409  }
  0x1f   :  { %198 = vmatprep.mubr.bf16.mxu0 %v553_v0  ;;  %412 = vset.pattern.permute.xlu0 %v553_v0  ;;  %v415_v2 = vld [vmem:[#allocation5 + $0x70] ss:$8 sps:$4 sm:$0xff]   ;;  %v416_v3 = vld [vmem:[#allocation5 + $0x64] ss:$8 sps:$4 sm:$0xff]   ;;  %v418_v4 = vld [vmem:[#allocation5 + $0x60] ss:$8 sps:$4 sm:$0xff]  }
  0x20   :  { %411 = vset.pattern.permute.xlu1 %v553_v0  ;;  %166 = vmatprep.subr.bf16.mxu0 %v413_v1  ;;  %v419_v5 = vld [vmem:[#allocation5 + $0x54] ss:$8 sps:$4 sm:$0xff]   ;;  %v421_v6 = vld [vmem:[#allocation5 + $0x50] ss:$8 sps:$4 sm:$0xff]   ;;  %v422_v7 = vld [vmem:[#allocation5 + $0x44] ss:$8 sps:$4 sm:$0xff]  }
  0x21   :  { %167 = vmatpush1.bf16.msra.mxu0 %v415_v2  ;;  %v424_v8 = vld [vmem:[#allocation5 + $0x40] ss:$8 sps:$4 sm:$0xff]   ;;  %v425_v9 = vld [vmem:[#allocation5 + $0x34] ss:$8 sps:$4 sm:$0xff]   ;;  %v427_v10 = vld [vmem:[#allocation5 + $0x30] ss:$8 sps:$4 sm:$0xff]  }
  0x22   :  { %168 = vmatprep.subr.bf16.mxu0 %v416_v3  ;;  %v428_v11 = vld [vmem:[#allocation5 + $0x24] ss:$8 sps:$4 sm:$0xff]   ;;  %v430_v12 = vld [vmem:[#allocation5 + $0x20] ss:$8 sps:$4 sm:$0xff]   ;;  %v431_v13 = vld [vmem:[#allocation5 + $0x14] ss:$8 sps:$4 sm:$0xff]  }
  0x23   :  { %v433_v14 = vld [vmem:[#allocation5 + $0x10] ss:$8 sps:$4 sm:$0xff]   ;;  %v434_v15 = vld [vmem:[#allocation5 + $0x4] ss:$8 sps:$4 sm:$0xff]   ;;  %v436_v16 = vld [vmem:[#allocation5] ss:$8 sps:$4 sm:$0xff]  }
  0x24   :  { %v592_v17 = vld [vmem:[#allocation2] sm:$0xff]   ;;  %v71_v19 = vshrl.u32 %v70_v18, 7  ;;  %v241_v48 = vand.u32 127, %v70_v18  ;;  %vm253_vm1 = vcmask 58368  }
  0x25   :  { %169 = vmatpush1.bf16.msra.mxu0 %v418_v4  ;;  %v68_v21 = vld [vmem:[%s623_s2] sm:$0x3]  ;;  %v311_v18 = vunpack.c.h.bf16 %v592_v17 }
  0x26   :  { %170 = vmatprep.subr.bf16.mxu0 %v419_v5  ;;  %v595_v20 = vsub.s32 1, %v71_v19  ;;  %v72_v31 = vsub.s32 0, %v71_v19  ;;  %v401_v41 = vld [vmem:[%s624_s3] ss:$0 sm:$0xff]  ;;  %v244_v50 = vsub.s32 %v241_v48, %v71_v19  ;;  %s554_s3 = smov [#allocation8]  }
  0x27   :  { %s368_s8 = sshll.u32 %s554_s3, 4  ;;  %s369_s8 = int_to_ptr.vmem [resolvable:$true] %s368_s8 }
  0x28   :  { %v77_v22 = vrot.slane %v68_v21, %v595_v20  ;;  %v73_v32 = vrot.slane %v68_v21, %v72_v31  ;;  %s499_s9 = scalar_lea.vmem %s369_s8, 32  ;;  %p504_p11 = scmp.lt.s32.totalorder %s369_s8, %s369_s8 }
  0x29   :  { %171 = vmatpush1.bf16.msra.mxu0 %v421_v6  ;;  %p500_p10 = scmp.ne.s32.totalorder %s369_s8, %s499_s9  ;;  %p505_p12 = scmp.lt.s32.totalorder %s499_s9, %s499_s9 }
  0x2a   :  { %172 = vmatprep.subr.bf16.mxu0 %v422_v7 }
  0x2b   :  { %p506_p13 = por %p505_p12, %p504_p11 }
  0x2d   :  { %173 = vmatpush1.bf16.msra.mxu0 %v424_v8  ;;  %p507_p0 = pnand %p506_p13, %p500_p10 }
  0x2e   :  { %174 = vmatprep.subr.bf16.mxu0 %v425_v9 }
  0x31   :  { %175 = vmatpush1.bf16.msra.mxu0 %v427_v10 }
  0x32   :  { %176 = vmatprep.subr.bf16.mxu0 %v428_v11 }
  0x35   :  { %177 = vmatpush1.bf16.msra.mxu0 %v430_v12 }
  0x36   :  { %178 = vmatprep.subr.bf16.mxu0 %v431_v13 }
  0x39   :  { %179 = vmatpush1.bf16.msra.mxu0 %v433_v14  ;;  %v310_v14 = vunpack.c.l.bf16 %v592_v17 }
  0x3a   :  { %180 = vmatprep.subr.bf16.mxu0 %v434_v15 }
  0x3d   :  { %181 = vmatpush1.bf16.msra.mxu0 %v436_v16 }
  0x40   :  { %199 = vmatmul.mubr.bf16.vlgmr.msra.gmra.mxu0 %v592_v17 }
 0x100   :  { %v200_v23 = vpop.f32.mrf.mxu0 }
 0x101   :  { %v201_v33 = vadd.f32 %v200_v23, %v73_v32 }
 0x102   :  { %v202_v24 = vpop.f32.mrf.mxu0 }
 0x103   :  { %v203_v25 = vadd.f32 %v202_v24, %v77_v22 }
 0x104   :  { %v204_v26 = vpop.f32.mrf.mxu0 }
 0x105   :  { %v399_v27 = vmul.f32 -1.442695, %v203_v25  ;;  %v205_v36 = vadd.f32 %v204_v26, %v73_v32 }
 0x106   :  { %v206_v28 = vpop.f32.mrf.mxu0 }
 0x107   :  { %439 = vpow2.f32 %v399_v27  ;;  %v207_v29 = vadd.f32 %v206_v28, %v77_v22 }
 0x109   :  { %v400_v30 = vmul.f32 -1.442695, %v207_v29 }
 0x10b   :  { %441 = vpow2.f32 %v400_v30 }
 0x10c   :  { %443 = vtanh.f32 %v201_v33 }
 0x114   :  { %v440_v34 = vpop.eup %439 }
 0x115   :  { %v217_v35 = vadd.f32 1.0, %v440_v34 }
 0x117   :  { %445 = vrcp.f32 %v217_v35 }
 0x118   :  { %v442_v37 = vpop.eup %441  ;;  %447 = vtanh.f32 %v205_v36 }
 0x119   :  { %v218_v38 = vadd.f32 1.0, %v442_v37  ;;  %v444_v39 = vpop.eup %443 }
 0x11b   :  { %449 = vrcp.f32 %v218_v38 }
 0x124   :  { %v446_v40 = vpop.eup %445 }
 0x125   :  { %v223_v42 = vmul.f32 %v446_v40, %v444_v39  ;;  %v448_v43 = vpop.eup %447 }
 0x127   :  { %v232_v44 = vmul.f32 %v401_v41, %v223_v42 }
 0x128   :  { %v450_v45 = vpop.eup %449 }
 0x129   :  { %234 = vadd.xlane.f32.xlu0 %v232_v44  ;;  %v224_v46 = vmul.f32 %v450_v45, %v448_v43 }
 0x12b   :  { %v233_v47 = vmul.f32 %v401_v41, %v224_v46 }
 0x12d   :  { %236 = vadd.xlane.f32.xlu0 %v233_v47 }
 0x1b2   :  { %v235_v49 = vpop.xlane.xlu0 %234 }
 0x1b3   :  { %v245_v52 = vrot.slane %v235_v49, %v244_v50 }
 0x1b6   :  { %v237_v51 = vpop.xlane.xlu0 %236 }
 0x1b7   :  { %v249_v53 = vrot.slane %v237_v51, %v244_v50 }
 0x1b9   :  { %v251_v54 = vsel %vm250_vm0, %v249_v53, %v245_v52 }
 0x1ba   :  { %v254_v55 = vsel %vm253_vm1, %v251_v54, -inf }
 0x1bb   :  { %255 = vmax.xlane.f32.xlu1 %v254_v55 }
 0x244   :  { %v256_v56 = vpop.xlane.xlu1 %255 }
 0x245   :  { %v261_v57 = vrot.slane %v256_v56, %v72_v31  ;;  %v265_v58 = vrot.slane %v256_v56, %v595_v20 }
 0x247   :  { %v268_v59 = vsub.f32 %v235_v49, %v261_v57  ;;  %v269_v60 = vsub.f32 %v237_v51, %v265_v58 }
 0x249   :  { %v270_v61 = vmul.f32 1.442695, %v268_v59  ;;  %v272_v62 = vmul.f32 1.442695, %v269_v60 }
 0x24b   :  { %451 = vpow2.f32 %v270_v61 }
 0x24c   :  { %453 = vpow2.f32 %v272_v62 }
 0x258   :  { %v452_v63 = vpop.eup %451 }
 0x259   :  { %v454_v0 = vpop.eup %453  ;;  %277 = vperm.xlu1 %411, %v452_v63  }
 0x25a   :  { %280 = vperm.xlu0 %412, %v454_v0  }
 0x2d4   :  { %v278_v1 = vpop.permute.xlu1 %277 }
 0x2d5   :  { %v281_v2 = vpop.permute.xlu0 %280  ;;  %v285_v3 = vrot.slane %v278_v1, %v244_v50 }
 0x2d6   :  { %v289_v4 = vrot.slane %v281_v2, %v244_v50 }
 0x2d8   :  { %v290_v5 = vsel %vm250_vm0, %v289_v4, %v285_v3 }
 0x2d9   :  { %v292_v6 = vsel %vm253_vm1, %v290_v5, 0.0 }
 0x2da   :  { %293 = vadd.xlane.f32.xlu1 %v292_v6 }
 0x363   :  { %v294_v7 = vpop.xlane.xlu1 %293 }
 0x364   :  { %v299_v8 = vrot.slane %v294_v7, %v72_v31  ;;  %v303_v9 = vrot.slane %v294_v7, %v595_v20 }
 0x366   :  { %455 = vrcp.f32 %v299_v8 }
 0x367   :  { %457 = vrcp.f32 %v303_v9 }
 0x373   :  { %v456_v10 = vpop.eup %455 }
 0x374   :  { %v307_v11 = vmul.f32 %v456_v10, %v452_v63  ;;  %v458_v12 = vpop.eup %457 }
 0x375   :  { %v309_v13 = vmul.f32 %v458_v12, %v454_v0 }
 0x376   :  { %314 = vperm.xlu0 %412, %v307_v11  }
 0x37a   :  { %319 = vperm.xlu0 %412, %v309_v13  }
 0x3f1   :  { %v315_v15 = vpop.permute.xlu0 %314 }
 0x3f2   :  { %v322_v16 = vmul.f32 %v315_v15, %v310_v14  ;;  %v344_v20 = vrot.slane %v315_v15, %v244_v50 }
 0x3f4   :  { %v324_v19 = vrot.slane %v322_v16, 4 }
 0x3f5   :  { %v320_v21 = vpop.permute.xlu0 %319 }
 0x3f6   :  { %v325_v22 = vadd.f32 %v324_v19, %v322_v16  ;;  %v323_v23 = vmul.f32 %v320_v21, %v311_v18  ;;  %v348_v24 = vrot.slane %v320_v21, %v244_v50 }
 0x3f8   :  { %v326_v25 = vrot.slane %v325_v22, 2  ;;  %v330_v26 = vrot.slane %v323_v23, 4  ;;  %v349_v27 = vsel %vm250_vm0, %v348_v24, %v344_v20 }
 0x3f9   :  { %351 = vst.msk [vmem:[#allocation8] sm:$0x3] %vm253_vm1, %v349_v27 }
 0x3fa   :  { %v327_v28 = vadd.f32 %v326_v25, %v325_v22  ;;  %v331_v29 = vadd.f32 %v330_v26, %v323_v23 }
 0x3fb   :  { %510 = shalt.err (!%p507_p0)
}
 0x3fc   :  { %371 = dma.vmem_to_hbm [thread:$0]  %s369_s8, 32, %s626_s5, [#allocation9]   ;;  %v332_v17 = vrot.slane %v331_v29, 2  ;;  %v328_v30 = vrot.slane %v327_v28, 1 }
 0x3fd   :  { %s555_s12 = smov [#allocation7]  }
 0x3fe   :  { %v333_v31 = vadd.f32 %v332_v17, %v331_v29  ;;  %s358_s13 = sshll.u32 %s555_s12, 4  ;;  %v329_v34 = vadd.f32 %v328_v30, %v327_v28  ;;  %s359_s13 = int_to_ptr.vmem [resolvable:$true] %s358_s13 }
 0x3ff   :  { %s519_s14 = scalar_lea.vmem %s359_s13, 32  ;;  %p524_p2 = scmp.lt.s32.totalorder %s359_s13, %s359_s13 }
 0x400   :  { %v334_v32 = vrot.slane %v333_v31, 1  ;;  %p520_p1 = scmp.ne.s32.totalorder %s359_s13, %s519_s14  ;;  %p525_p3 = scmp.lt.s32.totalorder %s519_s14, %s519_s14 }
 0x402   :  { %v335_v33 = vadd.f32 %v334_v32, %v333_v31  ;;  %p526_p4 = por %p525_p3, %p524_p2 }
 0x404   :  { %v338_v35 = vsel %vm250_vm0, %v335_v33, %v329_v34  ;;  %p527_p5 = pnand %p526_p4, %p520_p1 }
 0x405   :  { %340 = vst [vmem:[#allocation7] sm:$0x3] %v338_v35 }
 0x406   :  { %530 = shalt.err (!%p527_p5)
}
 0x407   :  { %361 = dma.vmem_to_hbm [thread:$0]  %s359_s13, 32, %s625_s4, [#allocation4]  }
 0x408   :  { %543 = dma.done.wait [#allocation4], 32  }
 0x409   :  { %544 = vsyncadd [#allocation4], 4294967264 }
 0x40a   :  { %545 = dma.done.wait [#allocation9], 32  }
 0x40b   :  { %546 = vsyncadd [#allocation9], 4294967264 }
 0x40c   :  { %378 = vsyncpa [#allocation3], 1 }
 0x40d   :  { %379 = vsyncpa [#allocation6], 1 }
 0x40e   :  { %380 = vsyncpa [#allocation4], 1 }
 0x40f   :  { %381 = vsyncpa [#allocation9], 1 }

</bundles_post_ra>
